<compile_context>
chip_gen: v7x
topology: tpu7x:2x2x1
jax: 0.10.0
libtpu: 0.0.40
codegen_flags: <defaults>
</compile_context>

<pallas_src>
import jax
import jax.numpy as jnp
from jax.experimental import pallas as pl
from jax.experimental.pallas import tpu as pltpu

INPUT_NET = 20    # config.input_net  (forced to 20 by s.view(B, 1, 20))
NEURE = 32        # config.neure
OUTPUT_NET = 8    # config.output_net


def _round_up(x, m):
    return ((x + m - 1) // m) * m


def ddqn_mlp_kernel(x_ref, w1_ref, b1_ref, w2_ref, b2_ref, w3_ref, b3_ref, o_ref):
    # Batch-on-lanes layout (lane-dense):
    #   x_ref : (20, TB)    w1_ref: (32, 20)    b1_ref: (32, 1)
    #   w2_ref: (32, 32)    b2_ref: (32, 1)
    #   w3_ref: ( 8, 32)    b3_ref: ( 8, 1)     o_ref : ( 8, TB)
    x = x_ref[...]

    h1 = jnp.dot(w1_ref[...], x, preferred_element_type=jnp.float32) + b1_ref[...]
    h1 = jnp.maximum(h1, 0.0)                       # F.relu

    h2 = jnp.dot(w2_ref[...], h1, preferred_element_type=jnp.float32) + b2_ref[...]
    h2 = jnp.maximum(h2, 0.0)                       # F.relu

    out = jnp.dot(w3_ref[...], h2, preferred_element_type=jnp.float32) + b3_ref[...]
    o_ref[...] = out.astype(o_ref.dtype)


def prepare_params(params):
    """One-time parameter prep, hoisted out of the per-call path.

    Weights stay in native PyTorch (out, in) layout (no transposes needed with
    the batch-on-lanes formulation); biases become column vectors so they
    broadcast along the lane (batch) axis inside the kernel."""
    w1, b1, w2, b2, w3, b3 = params
    f32 = jnp.float32
    return (jnp.asarray(w1, f32), jnp.asarray(b1, f32).reshape(-1, 1),
            jnp.asarray(w2, f32), jnp.asarray(b2, f32).reshape(-1, 1),
            jnp.asarray(w3, f32), jnp.asarray(b3, f32).reshape(-1, 1))


def ddqn_forward(s, prepared_params, *, block_b=8192):
    """s: (B, input_net) float32.  Returns (B, 1, output_net), matching PyTorch."""
    w1, b1c, w2, b2c, w3, b3c = prepared_params
    B = s.shape[0]

    # Batch on the lane axis: one wrapper transpose (layout plumbing, not compute).
    xT = s.reshape(B, INPUT_NET).astype(jnp.float32).T          # (20, B)

    # Tile selection: lane-aligned (multiple of 128) tiles, big enough to
    # amortise per-grid-step overhead, capped so large batches still produce
    # >= 4 grid steps (lets v7x shard the "parallel" axis across both TCs).
    block_b = max(128, _round_up(block_b, 128))
    if B < 512:
        TB = B                                                  # single full-extent block
    else:
        TB = min(block_b, _round_up(pl.cdiv(B, 4), 128))
    grid = (pl.cdiv(B, TB),)                                    # partial final block OK

    weight_bytes = 4 * (w1.size + w2.size + w3.size + b1c.size + b2c.size + b3c.size)
    cost = pl.CostEstimate(
        flops=2 * B * (INPUT_NET * NEURE + NEURE * NEURE + NEURE * OUTPUT_NET),
        transcendentals=0,
        bytes_accessed=B * (INPUT_NET + OUTPUT_NET) * 4 + weight_bytes,
    )

    # v5e guard: only set an explicit VMEM limit if the (double-buffered) tiles
    # plus weights/activations would exceed the 16 MiB default scoped limit.
    vmem_est = (2 * TB * (INPUT_NET + OUTPUT_NET) * 4        # x/out double buffers
                + 2 * TB * NEURE * 4                          # activation headroom
                + weight_bytes)
    cp_kwargs = dict(dimension_semantics=("parallel",))       # batch axis independent
    if vmem_est > 16 * 1024 * 1024:
        cp_kwargs["vmem_limit_bytes"] = min(64 * 1024 * 1024, int(2 * vmem_est))

    const = lambda i: (0, 0)   # weights/biases: fetched once, stay VMEM-resident

    outT = pl.pallas_call(
        ddqn_mlp_kernel,
        out_shape=jax.ShapeDtypeStruct((OUTPUT_NET, B), jnp.float32),
        grid=grid,
        in_specs=[
            pl.BlockSpec((INPUT_NET, TB), lambda i: (0, i)),       # x tile (20, TB)
            pl.BlockSpec((NEURE, INPUT_NET), const),               # w1 (32, 20)
            pl.BlockSpec((NEURE, 1), const),                       # b1 (32, 1)
            pl.BlockSpec((NEURE, NEURE), const),                   # w2 (32, 32)
            pl.BlockSpec((NEURE, 1), const),                       # b2 (32, 1)
            pl.BlockSpec((OUTPUT_NET, NEURE), const),              # w3 (8, 32)
            pl.BlockSpec((OUTPUT_NET, 1), const),                  # b3 (8, 1)
        ],
        out_specs=pl.BlockSpec((OUTPUT_NET, TB), lambda i: (0, i)),  # out tile (8, TB)
        compiler_params=pltpu.CompilerParams(**cp_kwargs),
        cost_estimate=cost,
    )(xT, w1, b1c, w2, b2c, w3, b3c)

    # Back to PyTorch's (B, 1, output_net).
    return outT.T.reshape(B, 1, OUTPUT_NET)


def init_params(key):
    """weight.data.normal_(0, 0.1); biases deterministic (PyTorch default init
    is uniform, the init values are irrelevant to kernel semantics)."""
    k1, k2, k3, kb1, kb2, kb3 = jax.random.split(key, 6)
    w1 = 0.1 * jax.random.normal(k1, (NEURE, INPUT_NET), dtype=jnp.float32)
    w2 = 0.1 * jax.random.normal(k2, (NEURE, NEURE), dtype=jnp.float32)
    w3 = 0.1 * jax.random.normal(k3, (OUTPUT_NET, NEURE), dtype=jnp.float32)
    b1 = 0.01 * jax.random.normal(kb1, (NEURE,), dtype=jnp.float32)
    b2 = 0.01 * jax.random.normal(kb2, (NEURE,), dtype=jnp.float32)
    b3 = 0.01 * jax.random.normal(kb3, (OUTPUT_NET,), dtype=jnp.float32)
    return (w1, b1, w2, b2, w3, b3)


def ddqn_forward_ref(s, params):
    """Pure-JAX reference of the PyTorch forward."""
    w1, b1, w2, b2, w3, b3 = params
    s01 = s.reshape(s.shape[0], 1, INPUT_NET)
    s03 = jax.nn.relu(s01 @ w1.T + b1)
    out = jax.nn.relu(s03 @ w2.T + b2)
    return out @ w3.T + b3


if __name__ == "__main__":
    key = jax.random.PRNGKey(0)
    kx, kp = jax.random.split(key)
    params = init_params(kp)
    prepped = prepare_params(params)     # one-time prep, outside the call path

    # Small shape consistent with the module (B=2 rows of 20 features).
    B = 2
    s = jax.random.normal(kx, (B, INPUT_NET), dtype=jnp.float32)
    out = jax.block_until_ready(ddqn_forward(s, prepped))
    ref = jax.block_until_ready(ddqn_forward_ref(s, params))
    assert out.shape == (B, 1, OUTPUT_NET), out.shape
    assert jnp.allclose(out, ref, atol=1e-5, rtol=1e-5), jnp.max(jnp.abs(out - ref))

    # Exercise the multi-step grid + partial final block path (B not a multiple
    # of the 512-wide tile chosen for this size).
    B2 = 2000
    s2 = jax.random.normal(kx, (B2, INPUT_NET), dtype=jnp.float32)
    out2 = jax.block_until_ready(ddqn_forward(s2, prepped))
    ref2 = jax.block_until_ready(ddqn_forward_ref(s2, params))
    assert out2.shape == (B2, 1, OUTPUT_NET), out2.shape
    assert jnp.allclose(out2, ref2, atol=1e-5, rtol=1e-5), jnp.max(jnp.abs(out2 - ref2))

    print("KERNEL_OK")
</pallas_src>

<mosaic_0001>
module attributes {stable_mosaic.version = 11 : i64} {
  func.func @ddqn_mlp_kernel(%arg0: i32, %arg1: memref<20x2xf32, #tpu.memory_space<vmem>>, %arg2: memref<32x20xf32, #tpu.memory_space<vmem>>, %arg3: memref<32x1xf32, #tpu.memory_space<vmem>>, %arg4: memref<32x32xf32, #tpu.memory_space<vmem>>, %arg5: memref<32x1xf32, #tpu.memory_space<vmem>>, %arg6: memref<8x32xf32, #tpu.memory_space<vmem>>, %arg7: memref<8x1xf32, #tpu.memory_space<vmem>>, %arg8: memref<8x2xf32, #tpu.memory_space<vmem>>) attributes {dimension_semantics = [#tpu.dimension_semantics<parallel>], iteration_bounds = array<i64: 1>, scalar_prefetch = 0 : i64, scratch_operands = 0 : i64, tpu.core_type = #tpu.core_type<tc>, window_params = [{transform_indices = @transform_0, window_bounds = array<i64: 20, 2>}, {pipeline_mode = #tpu.pipeline_mode<synchronous>, transform_indices = @transform_1, window_bounds = array<i64: 32, 20>}, {pipeline_mode = #tpu.pipeline_mode<synchronous>, transform_indices = @transform_2, window_bounds = array<i64: 32, 1>}, {pipeline_mode = #tpu.pipeline_mode<synchronous>, transform_indices = @transform_3, window_bounds = array<i64: 32, 32>}, {pipeline_mode = #tpu.pipeline_mode<synchronous>, transform_indices = @transform_4, window_bounds = array<i64: 32, 1>}, {pipeline_mode = #tpu.pipeline_mode<synchronous>, transform_indices = @transform_5, window_bounds = array<i64: 8, 32>}, {pipeline_mode = #tpu.pipeline_mode<synchronous>, transform_indices = @transform_6, window_bounds = array<i64: 8, 1>}, {transform_indices = @transform_7, window_bounds = array<i64: 8, 2>}]} {
    %c0 = arith.constant 0 : index
    %c0_0 = arith.constant 0 : index
    %0 = vector.load %arg1[%c0, %c0_0] : memref<20x2xf32, #tpu.memory_space<vmem>>, vector<20x2xf32>
    %c0_1 = arith.constant 0 : index
    %c0_2 = arith.constant 0 : index
    %1 = vector.load %arg2[%c0_1, %c0_2] : memref<32x20xf32, #tpu.memory_space<vmem>>, vector<32x20xf32>
    %cst = arith.constant dense<0.000000e+00> : vector<32x2xf32>
    %2 = tpu.matmul %1, %0, %cst {dimension_numbers = #tpu.dot_dimension_numbers<[1], [0], [0], [1], [0, 0, 1, 1], [], []>} : vector<32x20xf32>, vector<20x2xf32>, vector<32x2xf32> -> vector<32x2xf32>
    %c0_3 = arith.constant 0 : index
    %c0_4 = arith.constant 0 : index
    %3 = vector.load %arg3[%c0_3, %c0_4] : memref<32x1xf32, #tpu.memory_space<vmem>>, vector<32x1xf32>
    %4 = vector.broadcast %3 : vector<32x1xf32> to vector<32x2xf32>
    %5 = arith.addf %2, %4 : vector<32x2xf32>
    %cst_5 = arith.constant 0.000000e+00 : f32
    %6 = vector.broadcast %cst_5 : f32 to vector<32x2xf32>
    %7 = arith.maximumf %5, %6 : vector<32x2xf32>
    %c0_6 = arith.constant 0 : index
    %c0_7 = arith.constant 0 : index
    %8 = vector.load %arg4[%c0_6, %c0_7] : memref<32x32xf32, #tpu.memory_space<vmem>>, vector<32x32xf32>
    %cst_8 = arith.constant dense<0.000000e+00> : vector<32x2xf32>
    %9 = tpu.matmul %8, %7, %cst_8 {dimension_numbers = #tpu.dot_dimension_numbers<[1], [0], [0], [1], [0, 0, 1, 1], [], []>} : vector<32x32xf32>, vector<32x2xf32>, vector<32x2xf32> -> vector<32x2xf32>
    %c0_9 = arith.constant 0 : index
    %c0_10 = arith.constant 0 : index
    %10 = vector.load %arg5[%c0_9, %c0_10] : memref<32x1xf32, #tpu.memory_space<vmem>>, vector<32x1xf32>
    %11 = vector.broadcast %10 : vector<32x1xf32> to vector<32x2xf32>
    %12 = arith.addf %9, %11 : vector<32x2xf32>
    %cst_11 = arith.constant 0.000000e+00 : f32
    %13 = vector.broadcast %cst_11 : f32 to vector<32x2xf32>
    %14 = arith.maximumf %12, %13 : vector<32x2xf32>
    %c0_12 = arith.constant 0 : index
    %c0_13 = arith.constant 0 : index
    %15 = vector.load %arg6[%c0_12, %c0_13] : memref<8x32xf32, #tpu.memory_space<vmem>>, vector<8x32xf32>
    %cst_14 = arith.constant dense<0.000000e+00> : vector<8x2xf32>
    %16 = tpu.matmul %15, %14, %cst_14 {dimension_numbers = #tpu.dot_dimension_numbers<[1], [0], [0], [1], [0, 0, 1, 1], [], []>} : vector<8x32xf32>, vector<32x2xf32>, vector<8x2xf32> -> vector<8x2xf32>
    %c0_15 = arith.constant 0 : index
    %c0_16 = arith.constant 0 : index
    %17 = vector.load %arg7[%c0_15, %c0_16] : memref<8x1xf32, #tpu.memory_space<vmem>>, vector<8x1xf32>
    %18 = vector.broadcast %17 : vector<8x1xf32> to vector<8x2xf32>
    %19 = arith.addf %16, %18 : vector<8x2xf32>
    %c0_17 = arith.constant 0 : index
    %c0_18 = arith.constant 0 : index
    %20 = vector.load %arg8[%c0_17, %c0_18] : memref<8x2xf32, #tpu.memory_space<vmem>>, vector<8x2xf32>
    tpu.vector_store %arg8[%c0_17, %c0_18], %19 {strides = array<i32>} : memref<8x2xf32, #tpu.memory_space<vmem>>, vector<8x2xf32>,
    return
  }
  func.func @transform_0(%arg0: i32) -> (i32, i32) {
    %c0_i32 = arith.constant 0 : i32
    %c0_i32_0 = arith.constant 0 : i32
    return %c0_i32, %arg0 : i32, i32
  }
  func.func @transform_1(%arg0: i32) -> (i32, i32) {
    %c0_i32 = arith.constant 0 : i32
    %c0_i32_0 = arith.constant 0 : i32
    %c0_i32_1 = arith.constant 0 : i32
    return %c0_i32, %c0_i32_0 : i32, i32
  }
  func.func @transform_2(%arg0: i32) -> (i32, i32) {
    %c0_i32 = arith.constant 0 : i32
    %c0_i32_0 = arith.constant 0 : i32
    %c0_i32_1 = arith.constant 0 : i32
    return %c0_i32, %c0_i32_0 : i32, i32
  }
  func.func @transform_3(%arg0: i32) -> (i32, i32) {
    %c0_i32 = arith.constant 0 : i32
    %c0_i32_0 = arith.constant 0 : i32
    %c0_i32_1 = arith.constant 0 : i32
    return %c0_i32, %c0_i32_0 : i32, i32
  }
  func.func @transform_4(%arg0: i32) -> (i32, i32) {
    %c0_i32 = arith.constant 0 : i32
    %c0_i32_0 = arith.constant 0 : i32
    %c0_i32_1 = arith.constant 0 : i32
    return %c0_i32, %c0_i32_0 : i32, i32
  }
  func.func @transform_5(%arg0: i32) -> (i32, i32) {
    %c0_i32 = arith.constant 0 : i32
    %c0_i32_0 = arith.constant 0 : i32
    %c0_i32_1 = arith.constant 0 : i32
    return %c0_i32, %c0_i32_0 : i32, i32
  }
  func.func @transform_6(%arg0: i32) -> (i32, i32) {
    %c0_i32 = arith.constant 0 : i32
    %c0_i32_0 = arith.constant 0 : i32
    %c0_i32_1 = arith.constant 0 : i32
    return %c0_i32, %c0_i32_0 : i32, i32
  }
  func.func @transform_7(%arg0: i32) -> (i32, i32) {
    %c0_i32 = arith.constant 0 : i32
    %c0_i32_0 = arith.constant 0 : i32
    return %c0_i32, %arg0 : i32, i32
  }
}

</mosaic_0001>

<bundles_post_ra>
// kernel: tpu_custom_call.1
= control target key start
LH: loop header
LB: loop body
LE: loop exit
PB: predicated region body
PF: predicated region fallthrough
CT: control target
= control target key end

     0   :  { %vm57_vm0 = vcmask 162816   ;;  %v470_v2 = vmov 0   ;;  %vm70_vm1 = vcmask 1043456   ;;  %vm191_vm2 = vcmask 261120   ;;  %s589_s0 = inlined_call_operand.vmem [shape: f32[20,2], index: 0, kind: input, shape index: {}]   ;;  %s590_s1 = inlined_call_operand.vmem [shape: f32[32,20], index: 1, kind: input, shape index: {}]   ;;  %s591_s2 = inlined_call_operand.vmem [shape: f32[32,1], index: 2, kind: input, shape index: {}]   ;;  %s592_s4 = inlined_call_operand.vmem [shape: f32[32,1], index: 4, kind: input, shape index: {}]   ;;  %s593_s6 = inlined_call_operand.vmem [shape: f32[8,1], index: 6, kind: input, shape index: {}]   ;;  %s594_s3 = inlined_call_operand.vmem [shape: f32[32,32], index: 3, kind: input, shape index: {}]   ;;  %s595_s5 = inlined_call_operand.vmem [shape: f32[8,32], index: 5, kind: input, shape index: {}]   ;;  %s596_s7 = inlined_call_operand.vmem [shape: f32[8,2], index: 7, kind: output, shape index: {}]  }
   0x1   :  { %v26_v0 = vld [vmem:[%s589_s0] sm:$0xff]  ;;  %v27_v1 = vld [vmem:[%s589_s0 + $0x8] sm:$0xff]  ;;  %468 = vset.pattern.permute.xlu0 %v470_v2  ;;  %469 = vset.pattern.permute.xlu1 %v470_v2  ;;  %v28_v5 = vld [vmem:[%s589_s0 + $0x10] sm:$0xf]  ;;  %v471_v40 = vmov 0.0|0.0   ;;  %vm472_vm3 = vmmov 0  }
   0x2   :  { %v446_v3 = vpack.c.bf16 %v27_v1, %v26_v0  ;;  %v29_v4 = vld [vmem:[%s590_s1] sm:$0xff]  ;;  %v35_v7 = vld [vmem:[%s591_s2 + $0x10] sm:$0xff]  ;;  %v34_v8 = vld [vmem:[%s591_s2 + $0x8] sm:$0xff]  ;;  %v473_v41 = vmov 0.0   ;;  %vm373_vm4 = vcmask 15360  }
   0x3   :  { %415 = vmatprep.mubr.msk.f32.mxu0 %vm57_vm0, %v29_v4  ;;  %v33_v6 = vld [vmem:[%s591_s2] sm:$0xff]  ;;  %49 = vperm.xlu1 %469, %v35_v7   ;;  %v36_v9 = vld [vmem:[%s591_s2 + $0x18] sm:$0xff]  ;;  %v30_v10 = vld [vmem:[%s590_s1 + $0x8] sm:$0xff] }
   0x4   :  { %447 = vmatprep.subr.bf16.mxu0 %v446_v3  ;;  %39 = vperm.xlu0 %468, %v33_v6   ;;  %v31_v11 = vld [vmem:[%s590_s1 + $0x10] sm:$0xff]  ;;  %v167_v12 = vld [vmem:[%s592_s4] sm:$0xff]  ;;  %v168_v13 = vld [vmem:[%s592_s4 + $0x8] sm:$0xff] }
   0x5   :  { %449 = vmatpush3.bf16.msra.mxu0 %v446_v3  ;;  %v32_v14 = vld [vmem:[%s590_s1 + $0x18] sm:$0xff]  ;;  %v169_v15 = vld [vmem:[%s592_s4 + $0x10] sm:$0xff]  ;;  %v294_v17 = vld [vmem:[%s593_s6] sm:$0xff] }
   0x6   :  { %413 = vmatprep.subr.msk.mxu0 %vm70_vm1, %v28_v5  ;;  %v170_v16 = vld [vmem:[%s592_s4 + $0x18] sm:$0xff]  ;;  %v163_v18 = vld [vmem:[%s594_s3] sm:$0xff]  ;;  %v164_v37 = vld [vmem:[%s594_s3 + $0x8] sm:$0xff] }
   0x7   :  { %54 = vperm.xlu1 %469, %v36_v9   ;;  %429 = vmatprep.mubr.msk.f32.mxu1 %vm191_vm2, %v163_v18  ;;  %v165_v38 = vld [vmem:[%s594_s3 + $0x10] sm:$0xff]  ;;  %v166_v39 = vld [vmem:[%s594_s3 + $0x18] sm:$0xff]  ;;  %v293_v60 = vld [vmem:[%s595_s5] sm:$0xff] }
   0x8   :  { %44 = vperm.xlu0 %468, %v34_v8  }
   0x9   :  { %414 = vmatpush3.msk.msra.mxu0 %vm70_vm1, %v28_v5 }
   0xa   :  { %416 = vmatmul.mubr.msk.f32.vlgmr.msra.gmra.mrb[0].mxu0 %vm57_vm0, %v30_v10  ;;  %458 = vmatprep.subr.bf16.mxu0 %v471_v40 }
   0xb   :  { %418 = vmatprep.mubr.msk.f32.mxu0 %vm57_vm0, %v31_v11  ;;  %178 = vperm.xlu1 %469, %v168_v13  }
   0xc   :  { %173 = vperm.xlu0 %468, %v167_v12  }
   0xe   :  { %419 = vmatmul.mubr.msk.f32.gmra.mrb[2].mxu0 %vm57_vm0, %v32_v14 }
   0xf   :  { %188 = vperm.xlu1 %469, %v170_v16   ;;  %443 = vmatprep.mubr.msk.f32.mxu0 %vm472_vm3, %v473_v41 }
  0x10   :  { %183 = vperm.xlu0 %468, %v169_v15  }
  0x14   :  { %297 = vperm.xlu0 %468, %v294_v17  }
  0x82   :  { %v50_v20 = vpop.permute.xlu1 %49 }
  0x83   :  { %v40_v19 = vpop.permute.xlu0 %39 }
  0x86   :  { %v55_v27 = vpop.permute.xlu1 %54 }
  0x87   :  { %v45_v21 = vpop.permute.xlu0 %44 }
  0x8a   :  { %v179_v42 = vpop.permute.xlu1 %178 }
  0x8b   :  { %v174_v43 = vpop.permute.xlu0 %173 }
  0x8e   :  { %v189_v49 = vpop.permute.xlu1 %188 }
  0x8f   :  { %v184_v52 = vpop.permute.xlu0 %183 }
  0x93   :  { %v298_v61 = vpop.permute.xlu0 %297 }
  0xdd   :  { %v417_v22 = vpop.f32.mrb[0].mxu0 }
  0xde   :  { %v146_v23 = vadd.f32 %v417_v22, %v45_v21  ;;  %v140_v24 = vpop.f32.mrb[1].mxu0 }
  0xdf   :  { %v141_v25 = vadd.f32 %v140_v24, %v40_v19 }
  0xe0   :  { %v160_v26 = vmax.f32 %v146_v23, 0.0 }
  0xe1   :  { %v159_v28 = vmax.f32 %v141_v25, 0.0  ;;  %v420_v29 = vpop.f32.mrb[2].mxu0 }
  0xe2   :  { %v156_v30 = vadd.f32 %v420_v29, %v55_v27  ;;  %v150_v31 = vpop.f32.mrb[3].mxu0 }
  0xe3   :  { %v151_v32 = vadd.f32 %v150_v31, %v50_v20  ;;  %v450_v33 = vpack.c.bf16 %v160_v26, %v159_v28 }
  0xe4   :  { %v162_v34 = vmax.f32 %v156_v30, 0.0 }
  0xe5   :  { %v161_v35 = vmax.f32 %v151_v32, 0.0  ;;  %451 = vmatprep.subr.bf16.mxu1 %v450_v33 }
  0xe6   :  { %453 = vmatpush3.bf16.msra.mxu1 %v450_v33 }
  0xe7   :  { %v454_v36 = vpack.c.bf16 %v162_v34, %v161_v35 }
  0xe9   :  { %455 = vmatprep.subr.bf16.mxu1 %v454_v36 }
  0xea   :  { %457 = vmatpush3.bf16.msra.mxu1 %v454_v36 }
  0xed   :  { %430 = vmatmul.mubr.msk.f32.vlgmr.msra.gmra.mrb[0].mxu1 %vm191_vm2, %v164_v37 }
  0xee   :  { %432 = vmatprep.mubr.msk.f32.mxu1 %vm191_vm2, %v165_v38 }
  0xf1   :  { %433 = vmatmul.mubr.msk.f32.gmra.mrb[2].mxu1 %vm191_vm2, %v166_v39 }
 0x1c0   :  { %v431_v44 = vpop.f32.mrb[0].mxu1 }
 0x1c1   :  { %v276_v45 = vadd.f32 %v431_v44, %v179_v42  ;;  %v270_v46 = vpop.f32.mrb[1].mxu1 }
 0x1c2   :  { %v271_v47 = vadd.f32 %v270_v46, %v174_v43 }
 0x1c3   :  { %v290_v48 = vmax.f32 %v276_v45, 0.0 }
 0x1c4   :  { %v289_v50 = vmax.f32 %v271_v47, 0.0  ;;  %v434_v51 = vpop.f32.mrb[2].mxu1 }
 0x1c5   :  { %v286_v53 = vadd.f32 %v434_v51, %v189_v49  ;;  %v280_v54 = vpop.f32.mrb[3].mxu1 }
 0x1c6   :  { %v459_v55 = vpack.c.bf16 %v290_v48, %v289_v50  ;;  %v281_v56 = vadd.f32 %v280_v54, %v184_v52 }
 0x1c7   :  { %v292_v57 = vmax.f32 %v286_v53, 0.0 }
 0x1c8   :  { %v291_v58 = vmax.f32 %v281_v56, 0.0  ;;  %460 = vmatpush3.bf16.msra.mxu0 %v459_v55 }
 0x1c9   :  { %461 = vmatprep.subr.bf16.mxu0 %v471_v40 }
 0x1ca   :  { %v462_v59 = vpack.c.bf16 %v292_v57, %v291_v58 }
 0x1cc   :  { %463 = vmatpush3.bf16.msra.mxu0 %v462_v59 }
 0x1cf   :  { %444 = vmatmul.mubr.msk.f32.vlgmr.msra.gmra.mrb[4].mxu0 %vm191_vm2, %v293_v60 }
 0x2a2   :  { %v369_v62 = vpop.f32.mrb[4].mxu0 }
 0x2a3   :  { %v370_v63 = vadd.f32 %v369_v62, %v298_v61  ;;  %v445_v0 = vpop.f32.mrb[5].mxu0 }
 0x2a5   :  { %374 = vst.msk [vmem:[%s596_s7] sm:$0xff] %vm373_vm4, %v370_v63 }

</bundles_post_ra>
